<compile_context>
chip_gen: v6e
topology: v6e:2x2x1
jax: 0.10.0
libtpu: 0.0.40
codegen_flags: <defaults>
</compile_context>

<pallas_src>
import functools

import jax
import jax.numpy as jnp
import numpy as np
from jax.experimental import pallas as pl
from jax.experimental.pallas import tpu as pltpu

PAD = 0          # padding_idx of the embedding table
LN_EPS = 1e-5    # torch.nn.LayerNorm default eps


def _variance_adaptor_kernel(
    x_ref,                                  # (1, T, D)  f32
    w1_ref, b1_ref, g1_ref, be1_ref,        # (3*D, F) bf16, (1, F) f32 x3
    w2_ref, b2_ref, g2_ref, be2_ref,        # (3*F, F) bf16, (1, F) f32 x3
    lw_ref,                                 # (1, F) f32   (Linear weight row)
    lb_ref,                                 # (1, 1) f32   (Linear bias, SMEM)
    blo_ref, bhi_ref,                       # (1, NB) f32  (bucket lo/hi edges)
    emb_ref,                                # (NB, D) bf16
    emb_out_ref, pred_out_ref,              # (1, T, D) f32, (1, T, 1) f32
    *, alpha,
):
    x = x_ref[0]                            # (T, D) f32
    T = x.shape[0]
    ridx = jax.lax.broadcasted_iota(jnp.int32, (T, 1), 0)   # row (time) index

    def conv3(h, w_ref, b_ref):
        # Conv1d(kernel_size=3, padding=1) over time, channels-last, as a single
        # MXU matmul: slab (T, 3*Cin) @ w (3*Cin, Cout), f32 accumulate.
        # Time shifts via XLU roll + one-row edge masks (no slice/concat copies
        # along the time axis).
        h_prev = jnp.where(ridx == 0, 0.0, pltpu.roll(h, shift=1, axis=0))      # h[t-1]
        h_next = jnp.where(ridx == T - 1, 0.0, pltpu.roll(h, shift=T - 1, axis=0))  # h[t+1]
        slab = jnp.concatenate([h_prev, h, h_next], axis=-1).astype(jnp.bfloat16)
        y = jnp.dot(slab, w_ref[...], preferred_element_type=jnp.float32)
        return y + b_ref[...]                                # (T, Cout) f32

    def layernorm(h, g_ref, b_ref):
        mu = jnp.mean(h, axis=-1, keepdims=True)
        var = jnp.mean((h - mu) * (h - mu), axis=-1, keepdims=True)
        return (h - mu) * jax.lax.rsqrt(var + LN_EPS) * g_ref[...] + b_ref[...]

    # ----- Predictor conv stack (LayerNorm/ReLU stay f32 on the VPU) -----
    h = jnp.maximum(layernorm(conv3(x, w1_ref, b1_ref), g1_ref, be1_ref), 0.0)
    # TODO(synk): nn.Dropout omitted (identity / inference semantics).
    h = jnp.maximum(layernorm(conv3(h, w2_ref, b2_ref), g2_ref, be2_ref), 0.0)

    # ----- Linear(F, 1) + ReLU as VPU mul + lane reduction (skip N=1 MXU pass) -----
    pred = jnp.sum(h * lw_ref[...], axis=-1, keepdims=True) + lb_ref[0, 0]
    pred = jnp.maximum(pred, 0.0)           # (T, 1)
    pred_out_ref[0] = pred

    # ----- target=None branch: bucketize + clip fused into a one-hot test -----
    # torch: buckets = clip(bucketize(log1p(alpha*(exp(pred)-1)), bins), 0, NB-1)
    # Here: one-hot[t, j] = (bins_lo[j] < v[t] <= bins_hi[j]) with
    # bins_lo[0] = -inf and bins_hi[NB-1] = +inf encoding the clip.
    logv = jnp.log1p(alpha * (jnp.exp(pred) - 1.0))          # (T, 1)
    onehot = ((blo_ref[...] < logv) & (logv <= bhi_ref[...])).astype(jnp.bfloat16)

    # ----- Embedding lookup as one-hot @ table on the MXU -----
    emb_out_ref[0] = jnp.dot(onehot, emb_ref[...], preferred_element_type=jnp.float32)


def variance_adaptor(x, params, *, alpha, target=None):
    """x: (B, T, D) float32.  Returns (emb_out (B, T, D), pred (B, T))."""
    B, T, D = x.shape
    NB = params["emb"].shape[0]

    def full(arr):
        idx = (0,) * arr.ndim
        return pl.BlockSpec(arr.shape, lambda b: idx)

    emb_out, pred3 = pl.pallas_call(
        functools.partial(_variance_adaptor_kernel, alpha=alpha),
        out_shape=(jax.ShapeDtypeStruct((B, T, D), jnp.float32),
                   jax.ShapeDtypeStruct((B, T, 1), jnp.float32)),
        grid=(B,),
        in_specs=[
            pl.BlockSpec((1, T, D), lambda b: (b, 0, 0)),
            full(params["w1"]), full(params["b1"]), full(params["g1"]), full(params["be1"]),
            full(params["w2"]), full(params["b2"]), full(params["g2"]), full(params["be2"]),
            full(params["lw"]),
            pl.BlockSpec(memory_space=pltpu.MemorySpace.SMEM),   # lb scalar -> SMEM
            full(params["bins_lo"]), full(params["bins_hi"]),
            full(params["emb_bf16"]),
        ],
        out_specs=(
            pl.BlockSpec((1, T, D), lambda b: (b, 0, 0)),
            # TODO(synk): pred block has lane width 1 (masked stores); fine for small T,
            # switch to a lane-dense (B, 1, T) layout for long utterances.
            pl.BlockSpec((1, T, 1), lambda b: (b, 0, 0)),
        ),
        compiler_params=pltpu.CompilerParams(
            dimension_semantics=("parallel",),   # B>=2 -> both v7x TensorCores used
            vmem_limit_bytes=32 << 20,
        ),
    )(
        x,
        params["w1"], params["b1"], params["g1"], params["be1"],
        params["w2"], params["b2"], params["g2"], params["be2"],
        params["lw"], params["lb"],
        params["bins_lo"], params["bins_hi"], params["emb_bf16"],
    )

    pred = pred3[..., 0]   # == torch .squeeze() for B > 1 (training-mode shape)

    if target is None:
        return emb_out, pred

    # target branch: plain-JAX glue (bucketize targets + embedding gather)
    buckets = jnp.searchsorted(params["bins"], jnp.log1p(target), side="left")
    emb_t = jnp.take(params["emb"], buckets, axis=0)
    return emb_t, pred


def init_params(key, encoder_dim, filter_size, num_bins, min_bin, max_bin):
    ks = jax.random.split(key, 8)
    D, F, NB = encoder_dim, filter_size, num_bins

    # Conv1d weights in torch layout (out, in, k).
    conv1_w = 0.05 * jax.random.normal(ks[0], (F, D, 3), jnp.float32)
    conv1_b = 0.05 * jax.random.normal(ks[1], (F,), jnp.float32)
    conv2_w = 0.05 * jax.random.normal(ks[2], (F, F, 3), jnp.float32)
    conv2_b = 0.05 * jax.random.normal(ks[3], (F,), jnp.float32)
    lin_w = 0.05 * jax.random.normal(ks[4], (1, F), jnp.float32)   # torch (out, in)
    lin_b = 0.05 * jax.random.normal(ks[5], (1,), jnp.float32)
    emb = 0.1 * jax.random.normal(ks[6], (NB, D), jnp.float32)
    emb = emb.at[PAD].set(0.0)                                     # padding_idx row = 0

    bins = jnp.linspace(np.log1p(min_bin), np.log1p(max_bin + 1), NB).astype(jnp.float32)
    # Fused bucketize+clip edges: bucket j <=> bins_lo[j] < v <= bins_hi[j].
    bins_lo = jnp.concatenate([jnp.array([-jnp.inf], jnp.float32), bins[:-1]])
    bins_hi = bins.at[NB - 1].set(jnp.inf)

    def pack_conv(w):
        # (out, in, k) -> (3*in, out) in bf16; row block k*Cin+cin multiplies the
        # tap-k-shifted input (k=0 -> x[t-1], k=1 -> x[t], k=2 -> x[t+1]).
        return (jnp.transpose(w, (2, 1, 0))
                .reshape(3 * w.shape[1], w.shape[0])
                .astype(jnp.bfloat16))

    return {
        "w1": pack_conv(conv1_w),                  # (3*D, F) bf16
        "b1": conv1_b.reshape(1, F),
        "g1": jnp.ones((1, F), jnp.float32),       # LayerNorm weight init
        "be1": jnp.zeros((1, F), jnp.float32),     # LayerNorm bias init
        "w2": pack_conv(conv2_w),                  # (3*F, F) bf16
        "b2": conv2_b.reshape(1, F),
        "g2": jnp.ones((1, F), jnp.float32),
        "be2": jnp.zeros((1, F), jnp.float32),
        "lw": lin_w,                               # (1, F) f32 (VPU row, not MXU)
        "lb": lin_b.reshape(1, 1),                 # SMEM scalar
        "bins": bins,                              # for the target branch
        "bins_lo": bins_lo.reshape(1, NB),
        "bins_hi": bins_hi.reshape(1, NB),
        "emb": emb,                                # f32, target-branch gather
        "emb_bf16": emb.astype(jnp.bfloat16),      # MXU one-hot lookup table
    }


if __name__ == "__main__":
    B, T, D, F, NB = 2, 16, 32, 32, 16
    min_bin, max_bin, alpha = 0.0, 100.0, 1.0

    key = jax.random.PRNGKey(0)
    kx, kp = jax.random.split(key)
    x = jax.random.normal(kx, (B, T, D), jnp.float32)
    params = init_params(kp, D, F, NB, min_bin, max_bin)

    emb_out, pred = variance_adaptor(x, params, alpha=alpha, target=None)
    jax.block_until_ready((emb_out, pred))

    assert emb_out.shape == (B, T, D) and pred.shape == (B, T)
    assert bool(jnp.all(jnp.isfinite(emb_out))) and bool(jnp.all(jnp.isfinite(pred)))

    # Structural check: every output row must equal one row of the (bf16) table,
    # i.e. the fused bucketize/one-hot really selected exactly one embedding.
    table = params["emb_bf16"].astype(jnp.float32)                    # (NB, D)
    err = jnp.min(jnp.max(jnp.abs(emb_out[:, :, None, :] - table[None, None]),
                          axis=-1), axis=-1)
    assert float(jnp.max(err)) < 1e-4, float(jnp.max(err))

    print("KERNEL_OK")
</pallas_src>

<mosaic_0001>
module attributes {stable_mosaic.version = 11 : i64} {
  func.func @_variance_adaptor_kernel(%arg0: i32, %arg1: memref<1x16x32xf32, #tpu.memory_space<vmem>>, %arg2: memref<96x32xbf16, #tpu.memory_space<vmem>>, %arg3: memref<1x32xf32, #tpu.memory_space<vmem>>, %arg4: memref<1x32xf32, #tpu.memory_space<vmem>>, %arg5: memref<1x32xf32, #tpu.memory_space<vmem>>, %arg6: memref<96x32xbf16, #tpu.memory_space<vmem>>, %arg7: memref<1x32xf32, #tpu.memory_space<vmem>>, %arg8: memref<1x32xf32, #tpu.memory_space<vmem>>, %arg9: memref<1x32xf32, #tpu.memory_space<vmem>>, %arg10: memref<1x32xf32, #tpu.memory_space<vmem>>, %arg11: memref<1x1xf32, #tpu.memory_space<smem>>, %arg12: memref<1x16xf32, #tpu.memory_space<vmem>>, %arg13: memref<1x16xf32, #tpu.memory_space<vmem>>, %arg14: memref<16x32xbf16, #tpu.memory_space<vmem>>, %arg15: memref<1x16x32xf32, #tpu.memory_space<vmem>>, %arg16: memref<1x16x1xf32, #tpu.memory_space<vmem>>) attributes {dimension_semantics = [#tpu.dimension_semantics<parallel>], iteration_bounds = array<i64: 2>, scalar_prefetch = 0 : i64, scratch_operands = 0 : i64, tpu.core_type = #tpu.core_type<tc>, window_params = [{transform_indices = @transform_0, window_bounds = array<i64: 1, 16, 32>}, {pipeline_mode = #tpu.pipeline_mode<synchronous>, transform_indices = @transform_1, window_bounds = array<i64: 96, 32>}, {pipeline_mode = #tpu.pipeline_mode<synchronous>, transform_indices = @transform_2, window_bounds = array<i64: 1, 32>}, {pipeline_mode = #tpu.pipeline_mode<synchronous>, transform_indices = @transform_3, window_bounds = array<i64: 1, 32>}, {pipeline_mode = #tpu.pipeline_mode<synchronous>, transform_indices = @transform_4, window_bounds = array<i64: 1, 32>}, {pipeline_mode = #tpu.pipeline_mode<synchronous>, transform_indices = @transform_5, window_bounds = array<i64: 96, 32>}, {pipeline_mode = #tpu.pipeline_mode<synchronous>, transform_indices = @transform_6, window_bounds = array<i64: 1, 32>}, {pipeline_mode = #tpu.pipeline_mode<synchronous>, transform_indices = @transform_7, window_bounds = array<i64: 1, 32>}, {pipeline_mode = #tpu.pipeline_mode<synchronous>, transform_indices = @transform_8, window_bounds = array<i64: 1, 32>}, {pipeline_mode = #tpu.pipeline_mode<synchronous>, transform_indices = @transform_9, window_bounds = array<i64: 1, 32>}, {transform_indices = @transform_10, window_bounds = array<i64: 1, 1>}, {pipeline_mode = #tpu.pipeline_mode<synchronous>, transform_indices = @transform_11, window_bounds = array<i64: 1, 16>}, {pipeline_mode = #tpu.pipeline_mode<synchronous>, transform_indices = @transform_12, window_bounds = array<i64: 1, 16>}, {pipeline_mode = #tpu.pipeline_mode<synchronous>, transform_indices = @transform_13, window_bounds = array<i64: 16, 32>}, {transform_indices = @transform_14, window_bounds = array<i64: 1, 16, 32>}, {transform_indices = @transform_15, window_bounds = array<i64: 1, 16, 1>}]} {
    %c0 = arith.constant 0 : index
    %c0_0 = arith.constant 0 : index
    %c0_1 = arith.constant 0 : index
    %0 = vector.load %arg1[%c0, %c0_0, %c0_1] : memref<1x16x32xf32, #tpu.memory_space<vmem>>, vector<1x16x32xf32>
    %1 = vector.shape_cast %0 : vector<1x16x32xf32> to vector<16x32xf32>
    %2 = tpu.iota {dimensions = array<i32: 0>} : vector<16x1xi32>
    %c0_i32 = arith.constant 0 : i32
    %3 = vector.broadcast %c0_i32 : i32 to vector<16x1xi32>
    %4 = arith.cmpi eq, %2, %3 : vector<16x1xi32>
    %c1_i32 = arith.constant 1 : i32
    %5 = tpu.dynamic_rotate %1 by %c1_i32 dim 0 : vector<16x32xf32>, i32 -> vector<16x32xf32>
    %cst = arith.constant 0.000000e+00 : f32
    %6 = vector.shape_cast %4 : vector<16x1xi1> to vector<16x1xi1>
    %7 = vector.broadcast %6 : vector<16x1xi1> to vector<16x32xi1>
    %8 = vector.broadcast %cst : f32 to vector<16x32xf32>
    %9 = arith.select %7, %8, %5 : vector<16x32xi1>, vector<16x32xf32>
    %c15_i32 = arith.constant 15 : i32
    %10 = vector.broadcast %c15_i32 : i32 to vector<16x1xi32>
    %11 = arith.cmpi eq, %2, %10 : vector<16x1xi32>
    %c15_i32_2 = arith.constant 15 : i32
    %12 = tpu.dynamic_rotate %1 by %c15_i32_2 dim 0 : vector<16x32xf32>, i32 -> vector<16x32xf32>
    %cst_3 = arith.constant 0.000000e+00 : f32
    %13 = vector.shape_cast %11 : vector<16x1xi1> to vector<16x1xi1>
    %14 = vector.broadcast %13 : vector<16x1xi1> to vector<16x32xi1>
    %15 = vector.broadcast %cst_3 : f32 to vector<16x32xf32>
    %16 = arith.select %14, %15, %12 : vector<16x32xi1>, vector<16x32xf32>
    %17 = tpu.concatenate %9, %1, %16 in 1 : vector<16x32xf32>, vector<16x32xf32>, vector<16x32xf32> -> vector<16x96xf32>
    %18 = arith.truncf %17 : vector<16x96xf32> to vector<16x96xbf16>
    %c0_4 = arith.constant 0 : index
    %c0_5 = arith.constant 0 : index
    %19 = vector.load %arg2[%c0_4, %c0_5] : memref<96x32xbf16, #tpu.memory_space<vmem>>, vector<96x32xbf16>
    %cst_6 = arith.constant dense<0.000000e+00> : vector<16x32xf32>
    %20 = tpu.matmul %18, %19, %cst_6 {dimension_numbers = #tpu.dot_dimension_numbers<[1], [0], [0], [1], [0, 0, 1, 1], [], []>} : vector<16x96xbf16>, vector<96x32xbf16>, vector<16x32xf32> -> vector<16x32xf32>
    %c0_7 = arith.constant 0 : index
    %c0_8 = arith.constant 0 : index
    %21 = vector.load %arg3[%c0_7, %c0_8] : memref<1x32xf32, #tpu.memory_space<vmem>>, vector<1x32xf32>
    %22 = vector.broadcast %21 : vector<1x32xf32> to vector<16x32xf32>
    %23 = arith.addf %20, %22 : vector<16x32xf32>
    %cst_9 = arith.constant dense<0.000000e+00> : vector<16xf32>
    %24 = vector.multi_reduction <add>, %23, %cst_9 [1] : vector<16x32xf32> to vector<16xf32>
    %25 = vector.shape_cast %24 : vector<16xf32> to vector<16x1xf32>
    %cst_10 = arith.constant 3.200000e+01 : f32
    %26 = vector.broadcast %cst_10 : f32 to vector<16x1xf32>
    %27 = arith.divf %25, %26 : vector<16x1xf32>
    %28 = vector.broadcast %27 : vector<16x1xf32> to vector<16x32xf32>
    %29 = arith.subf %23, %28 : vector<16x32xf32>
    %30 = vector.broadcast %27 : vector<16x1xf32> to vector<16x32xf32>
    %31 = arith.subf %23, %30 : vector<16x32xf32>
    %32 = arith.mulf %29, %31 : vector<16x32xf32>
    %cst_11 = arith.constant dense<0.000000e+00> : vector<16xf32>
    %33 = vector.multi_reduction <add>, %32, %cst_11 [1] : vector<16x32xf32> to vector<16xf32>
    %34 = vector.shape_cast %33 : vector<16xf32> to vector<16x1xf32>
    %cst_12 = arith.constant 3.200000e+01 : f32
    %35 = vector.broadcast %cst_12 : f32 to vector<16x1xf32>
    %36 = arith.divf %34, %35 : vector<16x1xf32>
    %37 = vector.broadcast %27 : vector<16x1xf32> to vector<16x32xf32>
    %38 = arith.subf %23, %37 : vector<16x32xf32>
    %cst_13 = arith.constant 9.99999974E-6 : f32
    %39 = vector.broadcast %cst_13 : f32 to vector<16x1xf32>
    %40 = arith.addf %36, %39 : vector<16x1xf32>
    %41 = math.rsqrt %40 : vector<16x1xf32>
    %42 = vector.broadcast %41 : vector<16x1xf32> to vector<16x32xf32>
    %43 = arith.mulf %38, %42 : vector<16x32xf32>
    %c0_14 = arith.constant 0 : index
    %c0_15 = arith.constant 0 : index
    %44 = vector.load %arg4[%c0_14, %c0_15] : memref<1x32xf32, #tpu.memory_space<vmem>>, vector<1x32xf32>
    %45 = vector.broadcast %44 : vector<1x32xf32> to vector<16x32xf32>
    %46 = arith.mulf %43, %45 : vector<16x32xf32>
    %c0_16 = arith.constant 0 : index
    %c0_17 = arith.constant 0 : index
    %47 = vector.load %arg5[%c0_16, %c0_17] : memref<1x32xf32, #tpu.memory_space<vmem>>, vector<1x32xf32>
    %48 = vector.broadcast %47 : vector<1x32xf32> to vector<16x32xf32>
    %49 = arith.addf %46, %48 : vector<16x32xf32>
    %cst_18 = arith.constant 0.000000e+00 : f32
    %50 = vector.broadcast %cst_18 : f32 to vector<16x32xf32>
    %51 = arith.maximumf %49, %50 : vector<16x32xf32>
    %c0_i32_19 = arith.constant 0 : i32
    %52 = vector.broadcast %c0_i32_19 : i32 to vector<16x1xi32>
    %53 = arith.cmpi eq, %2, %52 : vector<16x1xi32>
    %c1_i32_20 = arith.constant 1 : i32
    %54 = tpu.dynamic_rotate %51 by %c1_i32_20 dim 0 : vector<16x32xf32>, i32 -> vector<16x32xf32>
    %cst_21 = arith.constant 0.000000e+00 : f32
    %55 = vector.shape_cast %53 : vector<16x1xi1> to vector<16x1xi1>
    %56 = vector.broadcast %55 : vector<16x1xi1> to vector<16x32xi1>
    %57 = vector.broadcast %cst_21 : f32 to vector<16x32xf32>
    %58 = arith.select %56, %57, %54 : vector<16x32xi1>, vector<16x32xf32>
    %c15_i32_22 = arith.constant 15 : i32
    %59 = vector.broadcast %c15_i32_22 : i32 to vector<16x1xi32>
    %60 = arith.cmpi eq, %2, %59 : vector<16x1xi32>
    %c15_i32_23 = arith.constant 15 : i32
    %61 = tpu.dynamic_rotate %51 by %c15_i32_23 dim 0 : vector<16x32xf32>, i32 -> vector<16x32xf32>
    %cst_24 = arith.constant 0.000000e+00 : f32
    %62 = vector.shape_cast %60 : vector<16x1xi1> to vector<16x1xi1>
    %63 = vector.broadcast %62 : vector<16x1xi1> to vector<16x32xi1>
    %64 = vector.broadcast %cst_24 : f32 to vector<16x32xf32>
    %65 = arith.select %63, %64, %61 : vector<16x32xi1>, vector<16x32xf32>
    %66 = tpu.concatenate %58, %51, %65 in 1 : vector<16x32xf32>, vector<16x32xf32>, vector<16x32xf32> -> vector<16x96xf32>
    %67 = arith.truncf %66 : vector<16x96xf32> to vector<16x96xbf16>
    %c0_25 = arith.constant 0 : index
    %c0_26 = arith.constant 0 : index
    %68 = vector.load %arg6[%c0_25, %c0_26] : memref<96x32xbf16, #tpu.memory_space<vmem>>, vector<96x32xbf16>
    %cst_27 = arith.constant dense<0.000000e+00> : vector<16x32xf32>
    %69 = tpu.matmul %67, %68, %cst_27 {dimension_numbers = #tpu.dot_dimension_numbers<[1], [0], [0], [1], [0, 0, 1, 1], [], []>} : vector<16x96xbf16>, vector<96x32xbf16>, vector<16x32xf32> -> vector<16x32xf32>
    %c0_28 = arith.constant 0 : index
    %c0_29 = arith.constant 0 : index
    %70 = vector.load %arg7[%c0_28, %c0_29] : memref<1x32xf32, #tpu.memory_space<vmem>>, vector<1x32xf32>
    %71 = vector.broadcast %70 : vector<1x32xf32> to vector<16x32xf32>
    %72 = arith.addf %69, %71 : vector<16x32xf32>
    %cst_30 = arith.constant dense<0.000000e+00> : vector<16xf32>
    %73 = vector.multi_reduction <add>, %72, %cst_30 [1] : vector<16x32xf32> to vector<16xf32>
    %74 = vector.shape_cast %73 : vector<16xf32> to vector<16x1xf32>
    %cst_31 = arith.constant 3.200000e+01 : f32
    %75 = vector.broadcast %cst_31 : f32 to vector<16x1xf32>
    %76 = arith.divf %74, %75 : vector<16x1xf32>
    %77 = vector.broadcast %76 : vector<16x1xf32> to vector<16x32xf32>
    %78 = arith.subf %72, %77 : vector<16x32xf32>
    %79 = vector.broadcast %76 : vector<16x1xf32> to vector<16x32xf32>
    %80 = arith.subf %72, %79 : vector<16x32xf32>
    %81 = arith.mulf %78, %80 : vector<16x32xf32>
    %cst_32 = arith.constant dense<0.000000e+00> : vector<16xf32>
    %82 = vector.multi_reduction <add>, %81, %cst_32 [1] : vector<16x32xf32> to vector<16xf32>
    %83 = vector.shape_cast %82 : vector<16xf32> to vector<16x1xf32>
    %cst_33 = arith.constant 3.200000e+01 : f32
    %84 = vector.broadcast %cst_33 : f32 to vector<16x1xf32>
    %85 = arith.divf %83, %84 : vector<16x1xf32>
    %86 = vector.broadcast %76 : vector<16x1xf32> to vector<16x32xf32>
    %87 = arith.subf %72, %86 : vector<16x32xf32>
    %cst_34 = arith.constant 9.99999974E-6 : f32
    %88 = vector.broadcast %cst_34 : f32 to vector<16x1xf32>
    %89 = arith.addf %85, %88 : vector<16x1xf32>
    %90 = math.rsqrt %89 : vector<16x1xf32>
    %91 = vector.broadcast %90 : vector<16x1xf32> to vector<16x32xf32>
    %92 = arith.mulf %87, %91 : vector<16x32xf32>
    %c0_35 = arith.constant 0 : index
    %c0_36 = arith.constant 0 : index
    %93 = vector.load %arg8[%c0_35, %c0_36] : memref<1x32xf32, #tpu.memory_space<vmem>>, vector<1x32xf32>
    %94 = vector.broadcast %93 : vector<1x32xf32> to vector<16x32xf32>
    %95 = arith.mulf %92, %94 : vector<16x32xf32>
    %c0_37 = arith.constant 0 : index
    %c0_38 = arith.constant 0 : index
    %96 = vector.load %arg9[%c0_37, %c0_38] : memref<1x32xf32, #tpu.memory_space<vmem>>, vector<1x32xf32>
    %97 = vector.broadcast %96 : vector<1x32xf32> to vector<16x32xf32>
    %98 = arith.addf %95, %97 : vector<16x32xf32>
    %cst_39 = arith.constant 0.000000e+00 : f32
    %99 = vector.broadcast %cst_39 : f32 to vector<16x32xf32>
    %100 = arith.maximumf %98, %99 : vector<16x32xf32>
    %c0_40 = arith.constant 0 : index
    %c0_41 = arith.constant 0 : index
    %101 = vector.load %arg10[%c0_40, %c0_41] : memref<1x32xf32, #tpu.memory_space<vmem>>, vector<1x32xf32>
    %102 = vector.broadcast %101 : vector<1x32xf32> to vector<16x32xf32>
    %103 = arith.mulf %100, %102 : vector<16x32xf32>
    %cst_42 = arith.constant dense<0.000000e+00> : vector<16xf32>
    %104 = vector.multi_reduction <add>, %103, %cst_42 [1] : vector<16x32xf32> to vector<16xf32>
    %105 = vector.shape_cast %104 : vector<16xf32> to vector<16x1xf32>
    %c0_43 = arith.constant 0 : index
    %c0_44 = arith.constant 0 : index
    %106 = memref.load %arg11[%c0_43, %c0_44] : memref<1x1xf32, #tpu.memory_space<smem>>
    %107 = vector.broadcast %106 : f32 to vector<16x1xf32>
    %108 = arith.addf %105, %107 : vector<16x1xf32>
    %cst_45 = arith.constant 0.000000e+00 : f32
    %109 = vector.broadcast %cst_45 : f32 to vector<16x1xf32>
    %110 = arith.maximumf %108, %109 : vector<16x1xf32>
    %c0_46 = arith.constant 0 : index
    %c0_47 = arith.constant 0 : index
    %c0_48 = arith.constant 0 : index
    %111 = vector.load %arg16[%c0_46, %c0_47, %c0_48] : memref<1x16x1xf32, #tpu.memory_space<vmem>>, vector<1x16x1xf32>
    %112 = vector.shape_cast %111 : vector<1x16x1xf32> to vector<16x1xf32>
    %113 = vector.shape_cast %110 : vector<16x1xf32> to vector<1x16x1xf32>
    tpu.vector_store %arg16[%c0_46, %c0_47, %c0_48], %113 {strides = array<i32>} : memref<1x16x1xf32, #tpu.memory_space<vmem>>, vector<1x16x1xf32>,
    %114 = math.exp %110 : vector<16x1xf32>
    %cst_49 = arith.constant 1.000000e+00 : f32
    %115 = vector.broadcast %cst_49 : f32 to vector<16x1xf32>
    %116 = arith.subf %114, %115 : vector<16x1xf32>
    %cst_50 = arith.constant 1.000000e+00 : f32
    %117 = vector.broadcast %cst_50 : f32 to vector<16x1xf32>
    %118 = arith.mulf %117, %116 : vector<16x1xf32>
    %119 = math.log1p %118 : vector<16x1xf32>
    %c0_51 = arith.constant 0 : index
    %c0_52 = arith.constant 0 : index
    %120 = vector.load %arg12[%c0_51, %c0_52] : memref<1x16xf32, #tpu.memory_space<vmem>>, vector<1x16xf32>
    %121 = vector.broadcast %120 : vector<1x16xf32> to vector<16x16xf32>
    %122 = vector.broadcast %119 : vector<16x1xf32> to vector<16x16xf32>
    %123 = arith.cmpf olt, %121, %122 : vector<16x16xf32>
    %c0_53 = arith.constant 0 : index
    %c0_54 = arith.constant 0 : index
    %124 = vector.load %arg13[%c0_53, %c0_54] : memref<1x16xf32, #tpu.memory_space<vmem>>, vector<1x16xf32>
    %125 = vector.broadcast %119 : vector<16x1xf32> to vector<16x16xf32>
    %126 = vector.broadcast %124 : vector<1x16xf32> to vector<16x16xf32>
    %127 = arith.cmpf ole, %125, %126 : vector<16x16xf32>
    %128 = arith.andi %123, %127 : vector<16x16xi1>
    %129 = arith.extui %128 : vector<16x16xi1> to vector<16x16xi32>
    %130 = arith.sitofp %129 : vector<16x16xi32> to vector<16x16xf32>
    %131 = arith.truncf %130 : vector<16x16xf32> to vector<16x16xbf16>
    %c0_55 = arith.constant 0 : index
    %c0_56 = arith.constant 0 : index
    %132 = vector.load %arg14[%c0_55, %c0_56] : memref<16x32xbf16, #tpu.memory_space<vmem>>, vector<16x32xbf16>
    %cst_57 = arith.constant dense<0.000000e+00> : vector<16x32xf32>
    %133 = tpu.matmul %131, %132, %cst_57 {dimension_numbers = #tpu.dot_dimension_numbers<[1], [0], [0], [1], [0, 0, 1, 1], [], []>} : vector<16x16xbf16>, vector<16x32xbf16>, vector<16x32xf32> -> vector<16x32xf32>
    %c0_58 = arith.constant 0 : index
    %c0_59 = arith.constant 0 : index
    %c0_60 = arith.constant 0 : index
    %134 = vector.load %arg15[%c0_58, %c0_59, %c0_60] : memref<1x16x32xf32, #tpu.memory_space<vmem>>, vector<1x16x32xf32>
    %135 = vector.shape_cast %134 : vector<1x16x32xf32> to vector<16x32xf32>
    %136 = vector.shape_cast %133 : vector<16x32xf32> to vector<1x16x32xf32>
    tpu.vector_store %arg15[%c0_58, %c0_59, %c0_60], %136 {strides = array<i32>} : memref<1x16x32xf32, #tpu.memory_space<vmem>>, vector<1x16x32xf32>,
    return
  }
  func.func @transform_0(%arg0: i32) -> (i32, i32, i32) {
    %c0_i32 = arith.constant 0 : i32
    %c0_i32_0 = arith.constant 0 : i32
    %c0_i32_1 = arith.constant 0 : i32
    return %arg0, %c0_i32, %c0_i32_0 : i32, i32, i32
  }
  func.func @transform_1(%arg0: i32) -> (i32, i32) {
    %c0_i32 = arith.constant 0 : i32
    %c0_i32_0 = arith.constant 0 : i32
    %c0_i32_1 = arith.constant 0 : i32
    return %c0_i32, %c0_i32_0 : i32, i32
  }
  func.func @transform_2(%arg0: i32) -> (i32, i32) {
    %c0_i32 = arith.constant 0 : i32
    %c0_i32_0 = arith.constant 0 : i32
    %c0_i32_1 = arith.constant 0 : i32
    return %c0_i32, %c0_i32_0 : i32, i32
  }
  func.func @transform_3(%arg0: i32) -> (i32, i32) {
    %c0_i32 = arith.constant 0 : i32
    %c0_i32_0 = arith.constant 0 : i32
    %c0_i32_1 = arith.constant 0 : i32
    return %c0_i32, %c0_i32_0 : i32, i32
  }
  func.func @transform_4(%arg0: i32) -> (i32, i32) {
    %c0_i32 = arith.constant 0 : i32
    %c0_i32_0 = arith.constant 0 : i32
    %c0_i32_1 = arith.constant 0 : i32
    return %c0_i32, %c0_i32_0 : i32, i32
  }
  func.func @transform_5(%arg0: i32) -> (i32, i32) {
    %c0_i32 = arith.constant 0 : i32
    %c0_i32_0 = arith.constant 0 : i32
    %c0_i32_1 = arith.constant 0 : i32
    return %c0_i32, %c0_i32_0 : i32, i32
  }
  func.func @transform_6(%arg0: i32) -> (i32, i32) {
    %c0_i32 = arith.constant 0 : i32
    %c0_i32_0 = arith.constant 0 : i32
    %c0_i32_1 = arith.constant 0 : i32
    return %c0_i32, %c0_i32_0 : i32, i32
  }
  func.func @transform_7(%arg0: i32) -> (i32, i32) {
    %c0_i32 = arith.constant 0 : i32
    %c0_i32_0 = arith.constant 0 : i32
    %c0_i32_1 = arith.constant 0 : i32
    return %c0_i32, %c0_i32_0 : i32, i32
  }
  func.func @transform_8(%arg0: i32) -> (i32, i32) {
    %c0_i32 = arith.constant 0 : i32
    %c0_i32_0 = arith.constant 0 : i32
    %c0_i32_1 = arith.constant 0 : i32
    return %c0_i32, %c0_i32_0 : i32, i32
  }
  func.func @transform_9(%arg0: i32) -> (i32, i32) {
    %c0_i32 = arith.constant 0 : i32
    %c0_i32_0 = arith.constant 0 : i32
    %c0_i32_1 = arith.constant 0 : i32
    return %c0_i32, %c0_i32_0 : i32, i32
  }
  func.func @transform_10(%arg0: i32) -> (i32, i32) {
    %c0_i32 = arith.constant 0 : i32
    %c0_i32_0 = arith.constant 0 : i32
    %c0_i32_1 = arith.constant 0 : i32
    return %c0_i32, %c0_i32_0 : i32, i32
  }
  func.func @transform_11(%arg0: i32) -> (i32, i32) {
    %c0_i32 = arith.constant 0 : i32
    %c0_i32_0 = arith.constant 0 : i32
    %c0_i32_1 = arith.constant 0 : i32
    return %c0_i32, %c0_i32_0 : i32, i32
  }
  func.func @transform_12(%arg0: i32) -> (i32, i32) {
    %c0_i32 = arith.constant 0 : i32
    %c0_i32_0 = arith.constant 0 : i32
    %c0_i32_1 = arith.constant 0 : i32
    return %c0_i32, %c0_i32_0 : i32, i32
  }
  func.func @transform_13(%arg0: i32) -> (i32, i32) {
    %c0_i32 = arith.constant 0 : i32
    %c0_i32_0 = arith.constant 0 : i32
    %c0_i32_1 = arith.constant 0 : i32
    return %c0_i32, %c0_i32_0 : i32, i32
  }
  func.func @transform_14(%arg0: i32) -> (i32, i32, i32) {
    %c0_i32 = arith.constant 0 : i32
    %c0_i32_0 = arith.constant 0 : i32
    %c0_i32_1 = arith.constant 0 : i32
    return %arg0, %c0_i32, %c0_i32_0 : i32, i32, i32
  }
  func.func @transform_15(%arg0: i32) -> (i32, i32, i32) {
    %c0_i32 = arith.constant 0 : i32
    %c0_i32_0 = arith.constant 0 : i32
    %c0_i32_1 = arith.constant 0 : i32
    return %arg0, %c0_i32, %c0_i32_0 : i32, i32, i32
  }
}

</mosaic_0001>

<bundles_post_ra>
// kernel: tpu_custom_call.1
= control target key start
LH: loop header
LB: loop body
LE: loop exit
PB: predicated region body
PF: predicated region fallthrough
CT: control target
= control target key end

     0   :  { %s1728_s0 = inlined_call_operand.vmem [shape: f32[2,16,32], index: 0, kind: input, shape index: {}]   ;;  %s1729_s1 = inlined_call_operand.vmem [shape: bf16[96,32], index: 1, kind: input, shape index: {}]   ;;  %s1730_s2 = inlined_call_operand.vmem [shape: f32[1,32], index: 2, kind: input, shape index: {}]   ;;  %s1731_s3 = inlined_call_operand.vmem [shape: f32[1,32], index: 3, kind: input, shape index: {}]   ;;  %s1732_s4 = inlined_call_operand.vmem [shape: f32[1,32], index: 4, kind: input, shape index: {}]   ;;  %s1733_s5 = inlined_call_operand.vmem [shape: bf16[96,32], index: 5, kind: input, shape index: {}]   ;;  %s1734_s6 = inlined_call_operand.vmem [shape: f32[1,32], index: 6, kind: input, shape index: {}]   ;;  %s1735_s7 = inlined_call_operand.vmem [shape: f32[1,32], index: 7, kind: input, shape index: {}]   ;;  %s1736_s8 = inlined_call_operand.vmem [shape: f32[1,32], index: 8, kind: input, shape index: {}]   ;;  %s1737_s9 = inlined_call_operand.vmem [shape: f32[1,32], index: 9, kind: input, shape index: {}]   ;;  %s1738_s10 = inlined_call_operand.<no memory space> [shape: f32[1,1], index: 10, kind: input, shape index: {}]   ;;  %s1739_s11 = inlined_call_operand.vmem [shape: f32[1,16], index: 11, kind: input, shape index: {}]   ;;  %s1740_s12 = inlined_call_operand.vmem [shape: f32[1,16], index: 12, kind: input, shape index: {}]   ;;  %s1741_s13 = inlined_call_operand.vmem [shape: bf16[16,32], index: 13, kind: input, shape index: {}]   ;;  %s1742_s14 = inlined_call_operand.hbm [shape: f32[2,16,32], index: 14, kind: output, shape index: {0}]   ;;  %s1743_s15 = inlined_call_operand.vmem [shape: f32[2,16,1], index: 15, kind: output, shape index: {1}]  }
   0x1   :  { %1747 = sst [smem:[#allocation6_spill]] %s1728_s0 }
   0x2   :  { %1748 = sst [smem:[#allocation7_spill]] %s1729_s1 }
   0x3   :  { %1749 = sst [smem:[#allocation8_spill]] %s1730_s2 }
   0x4   :  { %1750 = sst [smem:[#allocation9_spill]] %s1731_s3 }
   0x5   :  { %21 = sst [smem:[#allocation2]] %s1738_s10 }
   0x6   :  { %22 = vsyncpa [#allocation4], 0 }
   0x7   :  { %24 = vsyncpa [#allocation4 + $0x1], 0  ;;  %s1470_s20 = smov 0   ;;  %s1472_s21 = smov 0  }
   0x8   :  { %s1474_s22 = smov 0   ;;  %s1476_s23 = smov 0  }
   0x9 LB: > { %s1491_s10 = sadd.s32 4294967295, %s1378_s23   ;;  %s1124_s24 = sadd.s32 4294967294, %s1378_s23   ;;  %s1378_s23 = sphi %s1476_s23, %s1763_s23   ;;  %s1374_s22 = sphi %s1474_s22, %s1762_s22   ;;  %s1370_s21 = sphi %s1472_s21, %s1761_s21   ;;  %s1366_s20 = sphi %s1470_s20, %s1760_s20  }
   0xa   : > { %s1495_s25 = sadd.s32 1, %s1378_s23   ;;  %s336_s26 = sadd.s32 1, %s1374_s22 }
   0xb   : > { %s333_s27 = ssub.s32 %s1378_s23, %s1495_s25  ;;  %p346_p0 = scmp.ne.s32.totalorder %s1374_s22, %s1370_s21 }
   0xc   : > { %p334_p1 = scmp.eq.s32.totalorder %s333_s27, 0  ;;  %p347_p2 = scmp.eq.s32.totalorder %s1491_s10, 1 }
   0xd   : > { %p352_p3 = scmp.ne.s32.totalorder %s1370_s21, %s1366_s20  ;;  %p353_p4 = scmp.eq.s32.totalorder %s1124_s24, 1 }
   0xe   : > { %s1506_s28 = scalar_select %p334_p1, %s1374_s22, %s336_s26  }
   0xf   : > { %p1508_p5 = por %p347_p2, %p346_p0  ;;  %p1512_p6 = por %p353_p4, %p352_p3 }
  0x10   : > { %p1127_p7 = scmp.ge.s32.totalorder %s1378_s23, 1  ;;  %p444_p8 = scmp.lt.s32.totalorder %s1378_s23, 3 }
  0x12   : > { %p445_p9 = pnand %p1127_p7, %p444_p8 }
  0x13   : > { %p497_p10 = scmp.lt.s32.totalorder (!%p445_p9), %s1491_s10, 1  ;;  %s1753_s1 = sld [smem:[#allocation7_spill]] (!%p445_p9) }
  0x14   : > { %448 = sbr.rel (%p445_p9) target bundleno = 1700 (0x6a4), region = 76  ;;  %s1754_s0 = sld [smem:[#allocation6_spill]] (!%p445_p9) }
  0x15   : > { %s1745_s27 = smov (!%p445_p9), 32   ;;  %s1746_s18 = smov (!%p445_p9), 64  }
  0x16   : > { %s1755_s2 = sld [smem:[#allocation8_spill]] (!%p445_p9) }
  0x17   : > { %s1756_s3 = sld [smem:[#allocation9_spill]] (!%p445_p9) }
  0x18   : > { %s902_s19 = sld [smem:[#allocation2]] (!%p445_p9) }
  0x19   : > { %v510_v0 = vlaneseq  ;;  %v1289_v1 = vld [vmem:[%s1753_s1 + $0x28] sm:$0xff]   ;;  %v1380_v2 = vmov 0.0   ;;  %v1290_v3 = vld [vmem:[%s1753_s1 + $0x20] sm:$0xff]   ;;  %s1528_s24 = scalar_select %p497_p10, %s1491_s10, 1  ;;  %v1291_v8 = vld [vmem:[%s1753_s1 + $0x18] sm:$0xff]   ;;  %vm1381_vm2 = vmmov 0  }
  0x1a   : > { %1186 = vmatprep.subr.bf16.mxu0 %v1380_v2  ;;  %1202 = vmatprep.subr.bf16.mxu1 %v1380_v2  ;;  %v1292_v18 = vld [vmem:[%s1753_s1 + $0x10] sm:$0xff]   ;;  %v1293_v21 = vld [vmem:[%s1753_s1 + $0x8] sm:$0xff]   ;;  %v1294_v22 = vld [vmem:[%s1753_s1] sm:$0xff]   ;;  %vm555_vm5 = vcmask 261120   ;;  %vm558_vm6 = vcmask 523264   ;;  %vm617_vm7 = vcmask 785408  }
  0x1b   : > { %v1530_v4 = vshrl.u32 %v510_v0, 7  ;;  %1187 = vmatpush3.bf16.msra.mxu0 %v1289_v1  ;;  %s1744_s26 = sshll.u32 %s1528_s24, 4  ;;  %1198 = vmatprep.mubr.msk.bf16.mxu0 %vm1381_vm2, %v1380_v2  ;;  %v1295_v54 = vld [vmem:[%s1733_s5 + $0x28] sm:$0xff]   ;;  %v1296_v55 = vld [vmem:[%s1733_s5 + $0x20] sm:$0xff]   ;;  %v1297_v56 = vld [vmem:[%s1733_s5 + $0x18] sm:$0xff]   ;;  %s1759_s16 = sshll.u32 %s1528_s24, 4 }
  0x1c   : > { %1188 = vmatprep.subr.bf16.mxu0 %v1380_v2  ;;  %s501_s17 = scalar_lea.vmem %s1754_s0, %s1744_s26  ;;  %1214 = vmatprep.mubr.msk.bf16.mxu1 %vm1381_vm2, %v1380_v2  ;;  %v1133_v35 = vld [vmem:[%s1755_s2] ss:$0 sm:$0xff]  ;;  %v1298_v57 = vld [vmem:[%s1733_s5 + $0x10] sm:$0xff]   ;;  %vm908_vm8 = vcmask 7168  }
  0x1d   : > { %v1535_v5 = vadd.s32 8, %v1530_v4  ;;  %v508_v6 = vld [vmem:[%s501_s17] sm:$0xff]  ;;  %v509_v7 = vld [vmem:[%s501_s17 + $0x8] sm:$0xff]  ;;  %vm530_vm0 = vcmp.lt.s32.totalorder %v1530_v4, 7  ;;  %vm517_vm1 = vcmp.lt.s32.totalorder %v1530_v4, 1  ;;  %vm513_vm4 = vcmp.eq.s32.totalorder %v1530_v4, 0  ;;  %1203 = vmatpush3.bf16.msra.mxu1 %v1295_v54 }
  0x1e   : > { %v516_v9 = vrot.slane %v509_v7, 7  ;;  %v529_v10 = vrot.slane %v509_v7, 1  ;;  %v1269_v11 = vpack.i.bf16 %v509_v7, %v508_v6  ;;  %v515_v12 = vrot.slane %v508_v6, 7  ;;  %1204 = vmatprep.subr.bf16.mxu1 %v1380_v2  ;;  %v1141_v1 = vld [vmem:[%s1756_s3] ss:$0 sm:$0xff]  ;;  %v1299_v7 = vld [vmem:[%s1733_s5 + $0x8] sm:$0xff]  }
  0x1f   : > { %1189 = vmatpush3.bf16.msra.mxu0 %v1290_v3  ;;  %v528_v13 = vrot.slane %v508_v6, 1  ;;  %vm527_vm3 = vcmp.eq.s32.totalorder %v1535_v5, 15  ;;  %v1142_v6 = vld [vmem:[%s1732_s4] ss:$0 sm:$0xff]  ;;  %s1758_s17 = smov 64  }
  0x20   : > { %1190 = vmatprep.subr.bf16.mxu0 %v1380_v2  ;;  %1270 = vrot.lane.b32.xlu0 %v1269_v11, %s1745_s27  ;;  %v518_v14 = vsel %vm517_vm1, %v515_v12, %v516_v9  ;;  %v519_v15 = vsel %vm517_vm1, %v516_v9, %v515_v12  ;;  %v1300_v12 = vld [vmem:[%s1733_s5] sm:$0xff]  }
  0x21   : > { %v531_v16 = vsel %vm530_vm0, %v528_v13, %v529_v10  ;;  %v532_v17 = vsel %vm530_vm0, %v529_v10, %v528_v13  ;;  %v524_v26 = vsel %vm513_vm4, 0.0, %v519_v15  ;;  %1205 = vmatpush3.bf16.msra.mxu1 %v1296_v55 }
  0x22   : > { %v538_v19 = vsel %vm527_vm3, 0.0, %v532_v17  ;;  %1206 = vmatprep.subr.bf16.mxu1 %v1380_v2 }
  0x23   : > { %1191 = vmatpush3.bf16.msra.mxu0 %v1291_v8  ;;  %v1274_v20 = vpack.i.bf16 %v538_v19, %v531_v16 }
  0x24   : > { %1192 = vmatprep.subr.bf16.mxu0 %v1380_v2 }
  0x25   : > { %1275 = vrot.lane.b32.xlu0 %v1274_v20, %s1746_s18  ;;  %1207 = vmatpush3.bf16.msra.mxu1 %v1297_v56  ;;  %s1757_s18 = smov 32  }
  0x26   : > { %1208 = vmatprep.subr.bf16.mxu1 %v1380_v2 }
  0x27   : > { %1193 = vmatpush3.bf16.msra.mxu0 %v1292_v18 }
  0x28   : > { %1194 = vmatprep.subr.bf16.mxu0 %v1380_v2 }
  0x29   : > { %1209 = vmatpush3.bf16.msra.mxu1 %v1298_v57 }
  0x2a   : > { %1210 = vmatprep.subr.bf16.mxu1 %v1380_v2 }
  0x2b   : > { %1195 = vmatpush3.bf16.msra.mxu0 %v1293_v21 }
  0x2c   : > { %1196 = vmatprep.subr.bf16.mxu0 %v1380_v2 }
  0x2d   : > { %1211 = vmatpush3.bf16.msra.mxu1 %v1299_v7 }
  0x2e   : > { %1212 = vmatprep.subr.bf16.mxu1 %v1380_v2 }
  0x2f   : > { %1197 = vmatpush3.bf16.msra.mxu0 %v1294_v22 }
  0x30   : > { %1218 = vmatprep.subr.bf16.mxu0 %v1380_v2 }
  0x31   : > { %1213 = vmatpush3.bf16.msra.mxu1 %v1300_v12 }
  0x92   : > { %v1271_v23 = vpop.permute.xlu0 %1270 }
  0x93   : > { %v1273_v24 = vunpack.i.h.bf16 %v1271_v23  ;;  %v1272_v25 = vunpack.i.l.bf16 %v1271_v23 }
  0x95   : > { %v556_v30 = vsel %vm555_vm5, %v524_v26, %v1272_v25  ;;  %v557_v31 = vsel %vm555_vm5, %v518_v14, %v1273_v24 }
  0x97   : > { %v1276_v27 = vpop.permute.xlu0 %1275 }
  0x98   : > { %v1278_v28 = vunpack.i.h.bf16 %v1276_v27  ;;  %v1277_v29 = vunpack.i.l.bf16 %v1276_v27 }
  0x9a   : > { %v559_v32 = vsel %vm558_vm6, %v556_v30, %v1277_v29  ;;  %v560_v33 = vsel %vm558_vm6, %v557_v31, %v1278_v28 }
  0x9b   : > { %v561_v34 = vpack.c.bf16 %v560_v33, %v559_v32 }
  0x9d   : > { %1199 = vmatmul.mubr.msk.bf16.vlgmr.msra.gmra.mxu0 %vm617_vm7, %v561_v34 }
  0x9e   : > { %1220 = vmatprep.mubr.msk.bf16.mxu0 %vm1381_vm2, %v1380_v2 }
 0x15d   : > { %v655_v36 = vpop.f32.mrf.mxu0 }
 0x15e   : > { %v656_v37 = vadd.f32 %v1133_v35, %v655_v36 }
 0x15f   : > { %v1200_v38 = vpop.f32.mrf.mxu0 }
 0x160   : > { %v662_v39 = vsel %vm555_vm5, %v656_v37, 0.0 }
 0x161   : > { %663 = vadd.xlane.f32.xlu1 %v662_v39  ;;  %v658_v40 = vpop.f32.mrf.mxu0  ;;  %v1143_v39 = vld [vmem:[%s1734_s6] ss:$0 sm:$0xff] }
 0x162   : > { %v659_v41 = vadd.f32 %v1133_v35, %v658_v40 }
 0x163   : > { %v1201_v42 = vpop.f32.mrf.mxu0 }
 0x164   : > { %v665_v43 = vsel %vm555_vm5, %v659_v41, 0.0 }
 0x165   : > { %666 = vadd.xlane.f32.xlu1 %v665_v43 }
 0x1ea   : > { %v664_v44 = vpop.xlane.xlu1 %663 }
 0x1eb   : > { %v669_v45 = vmul.f32 0.03125, %v664_v44 }
 0x1ed   : > { %v671_v46 = vsub.f32 %v656_v37, %v669_v45 }
 0x1ee   : > { %v667_v47 = vpop.xlane.xlu1 %666 }
 0x1ef   : > { %v670_v48 = vmul.f32 0.03125, %v667_v47  ;;  %v673_v49 = vmul.f32 %v671_v46, %v671_v46 }
 0x1f1   : > { %v672_v50 = vsub.f32 %v659_v41, %v670_v48  ;;  %v675_v51 = vsel %vm555_vm5, %v673_v49, 0.0 }
 0x1f2   : > { %676 = vadd.xlane.f32.xlu0 %v675_v51 }
 0x1f3   : > { %v674_v52 = vmul.f32 %v672_v50, %v672_v50 }
 0x1f5   : > { %v678_v53 = vsel %vm555_vm5, %v674_v52, 0.0 }
 0x1f6   : > { %679 = vadd.xlane.f32.xlu1 %v678_v53 }
 0x27b   : > { %v677_v58 = vpop.xlane.xlu0 %676 }
 0x27c   : > { %v681_v59 = vmul.f32 0.03125, %v677_v58 }
 0x27e   : > { %v683_v60 = vadd.f32 1e-05, %v681_v59 }
 0x27f   : > { %v680_v61 = vpop.xlane.xlu1 %679 }
 0x280   : > { %1302 = vrsqrt.f32 %v683_v60  ;;  %v682_v62 = vmul.f32 0.03125, %v680_v61 }
 0x282   : > { %v684_v63 = vadd.f32 1e-05, %v682_v62 }
 0x284   : > { %1304 = vrsqrt.f32 %v684_v63 }
 0x28d   : > { %v1303_v0 = vpop.eup %1302 }
 0x28e   : > { %v687_v3 = vmul.f32 %v1303_v0, %v671_v46  ;;  %v1151_v0 = vld [vmem:[%s1735_s7] ss:$0 sm:$0xff] }
 0x290   : > { %v696_v8 = vmul.f32 %v1141_v1, %v687_v3  ;;  %v1152_v3 = vld [vmem:[%s1736_s8] ss:$0 sm:$0xff] }
 0x291   : > { %v1305_v9 = vpop.eup %1304 }
 0x292   : > { %v688_v10 = vmul.f32 %v1305_v9, %v672_v50  ;;  %v705_v11 = vadd.f32 %v1142_v6, %v696_v8 }
 0x294   : > { %v697_v13 = vmul.f32 %v1141_v1, %v688_v10  ;;  %v707_v14 = vmax.f32 %v705_v11, 0.0  ;;  %v1153_v10 = vld [vmem:[%s1737_s9] ss:$0 sm:$0xff] }
 0x296   : > { %v706_v15 = vadd.f32 %v1142_v6, %v697_v13  ;;  %v715_v17 = vrot.slane %v707_v14, 1  ;;  %v709_v20 = vrot.slane %v707_v14, 7 }
 0x298   : > { %v708_v16 = vmax.f32 %v706_v15, 0.0 }
 0x29a   : > { %v1279_v18 = vpack.i.bf16 %v708_v16, %v707_v14  ;;  %v716_v19 = vrot.slane %v708_v16, 1  ;;  %v710_v21 = vrot.slane %v708_v16, 7 }
 0x29c   : > { %1280 = vrot.lane.b32.xlu1 %v1279_v18, %s1757_s18  ;;  %v717_v22 = vsel %vm530_vm0, %v715_v17, %v716_v19  ;;  %v718_v23 = vsel %vm530_vm0, %v716_v19, %v715_v17  ;;  %v711_v24 = vsel %vm517_vm1, %v709_v20, %v710_v21  ;;  %v712_v25 = vsel %vm517_vm1, %v710_v21, %v709_v20  ;;  %v1301_v19 = vld [vmem:[%s1741_s13] sm:$0xff]   ;;  %s506_s18 = scalar_lea.vmem %s1743_s15, %s1759_s16 }
 0x29d   : > { %v720_v26 = vsel %vm527_vm3, 0.0, %v718_v23  ;;  %v713_v32 = vsel %vm513_vm4, 0.0, %v712_v25  ;;  %1219 = vmatpush3.bf16.msra.mxu0 %v1301_v19  ;;  %v903_v20 = vstv %s902_s19  ;;  %vm968_vm1 = vcmask 130048   ;;  %s487_s19 = sand.u32 1, %s1370_s21  }
 0x29e   : > { %v1284_v27 = vpack.i.bf16 %v720_v26, %v717_v22  ;;  %s1128_s16 = sshll.u32 %s487_s19, 4  ;;  %s1688_s1 = scalar_lea.sflag [#allocation4], %s487_s19 }
 0x29f   : > { %s489_s26 = scalar_lea.vmem [#allocation3], %s1128_s16  ;;  %s1384_s16 = smov [#allocation3]  }
 0x2a0   : > { %1285 = vrot.lane.b32.xlu1 %v1284_v27, %s1758_s17  ;;  %s1034_s27 = sshll.u32 %s489_s26, 4  ;;  %s1322_s2 = sshll.u32 %s1384_s16, 4  ;;  %s1680_s27 = int_to_ptr.vmem [resolvable:$true] %s1034_s27  ;;  %s1323_s2 = int_to_ptr.vmem [resolvable:$false] %s1322_s2 }
 0x2a1   : > { %s1324_s3 = scalar_lea.vmem %s1323_s2, 512  ;;  %p1325_p0 = scmp.lt.s32.totalorder %s1680_s27, %s1323_s2 }
 0x30e   : > { %v1281_v28 = vpop.permute.xlu1 %1280 }
 0x30f   : > { %v1283_v29 = vunpack.i.h.bf16 %v1281_v28  ;;  %v1282_v30 = vunpack.i.l.bf16 %v1281_v28 }
 0x311   : > { %v737_v35 = vsel %vm555_vm5, %v713_v32, %v1282_v30  ;;  %v738_v36 = vsel %vm555_vm5, %v711_v24, %v1283_v29 }
 0x312   : > { %v1286_v31 = vpop.permute.xlu1 %1285 }
 0x313   : > { %v1288_v33 = vunpack.i.h.bf16 %v1286_v31  ;;  %v1287_v34 = vunpack.i.l.bf16 %v1286_v31 }
 0x315   : > { %v739_v37 = vsel %vm558_vm6, %v737_v35, %v1287_v34  ;;  %v740_v5 = vsel %vm558_vm6, %v738_v36, %v1288_v33 }
 0x316   : > { %v741_v38 = vpack.c.bf16 %v740_v5, %v739_v37 }
 0x318   : > { %1215 = vmatmul.mubr.msk.bf16.vlgmr.msra.gmra.mxu1 %vm617_vm7, %v741_v38 }
 0x3d8   : > { %v834_v40 = vpop.f32.mrf.mxu1 }
 0x3d9   : > { %v835_v4 = vadd.f32 %v1143_v39, %v834_v40 }
 0x3da   : > { %v1216_v41 = vpop.f32.mrf.mxu1 }
 0x3db   : > { %v841_v42 = vsel %vm555_vm5, %v835_v4, 0.0 }
 0x3dc   : > { %842 = vadd.xlane.f32.xlu1 %v841_v42  ;;  %v837_v43 = vpop.f32.mrf.mxu1  ;;  %v1157_v42 = vld [vmem:[%s1740_s12] ss:$0 sm:$0xff] }
 0x3dd   : > { %v838_v44 = vadd.f32 %v1143_v39, %v837_v43  ;;  %v1156_v39 = vld [vmem:[%s1739_s11] ss:$0 sm:$0xff] }
 0x3de   : > { %v1217_v45 = vpop.f32.mrf.mxu1 }
 0x3df   : > { %v844_v46 = vsel %vm555_vm5, %v838_v44, 0.0 }
 0x3e0   : > { %845 = vadd.xlane.f32.xlu0 %v844_v46 }
 0x465   : > { %v843_v47 = vpop.xlane.xlu1 %842 }
 0x466   : > { %v847_v48 = vmul.f32 0.03125, %v843_v47 }
 0x468   : > { %v849_v49 = vsub.f32 %v835_v4, %v847_v48 }
 0x469   : > { %v846_v50 = vpop.xlane.xlu0 %845 }
 0x46a   : > { %v848_v51 = vmul.f32 0.03125, %v846_v50  ;;  %v851_v52 = vmul.f32 %v849_v49, %v849_v49 }
 0x46c   : > { %v850_v53 = vsub.f32 %v838_v44, %v848_v51  ;;  %v853_v54 = vsel %vm555_vm5, %v851_v52, 0.0 }
 0x46d   : > { %854 = vadd.xlane.f32.xlu0 %v853_v54 }
 0x46e   : > { %v852_v55 = vmul.f32 %v850_v53, %v850_v53 }
 0x470   : > { %v856_v56 = vsel %vm555_vm5, %v852_v55, 0.0 }
 0x471   : > { %857 = vadd.xlane.f32.xlu0 %v856_v56 }
 0x4f6   : > { %v855_v57 = vpop.xlane.xlu0 %854 }
 0x4f7   : > { %v859_v58 = vmul.f32 0.03125, %v855_v57 }
 0x4f9   : > { %v861_v59 = vadd.f32 1e-05, %v859_v58 }
 0x4fa   : > { %v858_v60 = vpop.xlane.xlu0 %857 }
 0x4fb   : > { %1306 = vrsqrt.f32 %v861_v59  ;;  %v860_v61 = vmul.f32 0.03125, %v858_v60 }
 0x4fd   : > { %v862_v62 = vadd.f32 1e-05, %v860_v61 }
 0x4ff   : > { %1308 = vrsqrt.f32 %v862_v62 }
 0x508   : > { %v1307_v63 = vpop.eup %1306 }
 0x509   : > { %v865_v1 = vmul.f32 %v1307_v63, %v849_v49 }
 0x50b   : > { %v874_v6 = vmul.f32 %v1151_v0, %v865_v1 }
 0x50c   : > { %v1309_v7 = vpop.eup %1308 }
 0x50d   : > { %v883_v8 = vadd.f32 %v1152_v3, %v874_v6  ;;  %v866_v9 = vmul.f32 %v1309_v7, %v850_v53 }
 0x50f   : > { %v885_v11 = vmax.f32 %v883_v8, 0.0  ;;  %v875_v12 = vmul.f32 %v1151_v0, %v866_v9 }
 0x511   : > { %v894_v13 = vmul.f32 %v1153_v10, %v885_v11  ;;  %v884_v14 = vadd.f32 %v1152_v3, %v875_v12 }
 0x513   : > { %v896_v15 = vsel %vm555_vm5, %v894_v13, 0.0  ;;  %v886_v16 = vmax.f32 %v884_v14, 0.0 }
 0x514   : > { %897 = vadd.xlane.f32.xlu0 %v896_v15 }
 0x515   : > { %v895_v17 = vmul.f32 %v1153_v10, %v886_v16 }
 0x517   : > { %v899_v18 = vsel %vm555_vm5, %v895_v17, 0.0 }
 0x518   : > { %900 = vadd.xlane.f32.xlu0 %v899_v18 }
 0x59d   : > { %v898_v21 = vpop.xlane.xlu0 %897 }
 0x59e   : > { %v904_v22 = vadd.f32 %v903_v20, %v898_v21 }
 0x5a0   : > { %v906_v23 = vmax.f32 %v904_v22, 0.0 }
 0x5a1   : > { %v901_v24 = vpop.xlane.xlu0 %900 }
 0x5a2   : > { %909 = vst.msk [vmem:[%s506_s18] sm:$0xff] %vm908_vm8, %v906_v23  ;;  %v911_v25 = vmul.f32 1.442695, %v906_v23  ;;  %v905_v26 = vadd.f32 %v903_v20, %v901_v24 }
 0x5a4   : > { %1310 = vpow2.f32 %v911_v25  ;;  %v907_v27 = vmax.f32 %v905_v26, 0.0 }
 0x5a6   : > { %910 = vst.msk [vmem:[%s506_s18 + $0x8] sm:$0xff] %vm908_vm8, %v907_v27  ;;  %v913_v28 = vmul.f32 1.442695, %v907_v27  ;;  %s1169_s18 = sshll.u32 %s1491_s10, 8  ;;  %s1318_s10 = scalar_lea.vmem %s1680_s27, 256 }
 0x5a7   : > { %s1685_s0 = scalar_lea.hbm %s1742_s14, %s1169_s18  ;;  %p1319_p11 = scmp.ne.s32.totalorder %s1680_s27, %s1318_s10 }
 0x5a8   : > { %1312 = vpow2.f32 %v913_v28  ;;  %p1326_p1 = scmp.lt.s32.totalorder %s1324_s3, %s1318_s10 }
 0x5a9   : > { %p1320_p12 = pnand %p1319_p11, %p1508_p5 }
 0x5aa   : > { %p1327_p2 = por %p1326_p1, %p1325_p0 }
 0x5ab   : > { %p1321_p13 = pneg %p1320_p12 }
 0x5ad   : > { %p1328_p3 = pnand %p1327_p2, %p1321_p13 }
 0x5b1   : > { %v1311_v29 = vpop.eup %1310 }
 0x5b2   : > { %v1154_v30 = vadd.f32 -1.0, %v1311_v29 }
 0x5b4   : > { %v917_v31 = vadd.f32 1.0, %v1154_v30  ;;  %v920_v35 = vmul.f32 -0.5, %v1154_v30  ;;  %v923_v5 = vand.u32 2147483647, %v1154_v30 }
 0x5b5   : > { %v1313_v32 = vpop.eup %1312 }
 0x5b6   : > { %1314 = vlog2.f32 %v917_v31  ;;  %v1155_v33 = vadd.f32 -1.0, %v1313_v32  ;;  %v921_v36 = vadd.f32 1.0, %v920_v35  ;;  %vm924_vm9 = vcmp.lt.f32.partialorder %v923_v5, 0.0004427343 }
 0x5b8   : > { %v926_v34 = vadd.f32 1.0, %v1155_v33  ;;  %v929_v37 = vmul.f32 -0.5, %v1155_v33  ;;  %v922_v4 = vmul.f32 %v1154_v30, %v921_v36  ;;  %v932_v43 = vand.u32 2147483647, %v1155_v33 }
 0x5ba   : > { %1316 = vlog2.f32 %v926_v34  ;;  %v930_v41 = vadd.f32 1.0, %v929_v37  ;;  %vm933_vm12 = vcmp.lt.f32.partialorder %v932_v43, 0.0004427343 }
 0x5bc   : > { %v931_v47 = vmul.f32 %v1155_v33, %v930_v41 }
 0x5c3   : > { %v1315_v38 = vpop.eup %1314 }
 0x5c4   : > { %v919_v40 = vmul.f32 0.6931472, %v1315_v38 }
 0x5c6   : > { %v925_v44 = vsel %vm924_vm9, %v922_v4, %v919_v40 }
 0x5c7   : > { %v1317_v45 = vpop.eup %1316  ;;  %vm942_vm10 = vcmp.lt.f32.partialorder %v1156_v39, %v925_v44  ;;  %vm951_vm11 = vcmp.le.f32.partialorder %v925_v44, %v1157_v42 }
 0x5c8   : > { %v928_v46 = vmul.f32 0.6931472, %v1317_v45  ;;  %vm953_vm13 = vmand %vm942_vm10, %vm951_vm11 }
 0x5c9   : > { %v1158_v49 = vsel %vm953_vm13, 1.0, %v1380_v2 }
 0x5ca   : > { %v934_v48 = vsel %vm933_vm12, %v931_v47, %v928_v46 }
 0x5cb   : > { %vm943_vm14 = vcmp.lt.f32.partialorder %v1156_v39, %v934_v48  ;;  %vm952_vm15 = vcmp.le.f32.partialorder %v934_v48, %v1157_v42 }
 0x5cc   : > { %vm954_vm0 = vmand %vm943_vm14, %vm952_vm15 }
 0x5cd   : > { %v1159_v50 = vsel %vm954_vm0, 1.0, %v1380_v2 }
 0x5ce   : > { %v959_v51 = vpack.c.bf16 %v1159_v50, %v1158_v49 }
 0x5d0   : > { %1221 = vmatmul.mubr.msk.bf16.vlgmr.msra.gmra.mxu0 %vm968_vm1, %v959_v51 }
 0x690   : > { %v1006_v52 = vpop.f32.mrf.mxu0 }
 0x691   : > { %1013 = vst.msk [vmem:[%s489_s26] sm:$0xff] %vm555_vm5, %v1006_v52 }
 0x692   : > { %v1222_v53 = vpop.f32.mrf.mxu0 }
 0x694   : > { %v1009_v2 = vpop.f32.mrf.mxu0 }
 0x695   : > { %1014 = vst.msk [vmem:[%s489_s26 + $0x8] sm:$0xff] %vm555_vm5, %v1009_v2 }
 0x696   : > { %v1223_v54 = vpop.f32.mrf.mxu0 }
 0x697   : > { %1331 = shalt.err (!%p1328_p3)
}
 0x698   : > { %s1332_s19 = scalar_lea.hbm %s1685_s0, 256  ;;  %s1336_s24 = scalar_lea.hbm %s1742_s14, 512 }
 0x699   : > { %p1333_p4 = scmp.ne.s32.totalorder %s1685_s0, %s1332_s19  ;;  %p1337_p9 = scmp.lt.s32.totalorder %s1685_s0, %s1742_s14 }
 0x69a   : > { %p1338_p10 = scmp.lt.s32.totalorder %s1336_s24, %s1332_s19 }
 0x69b   : > { %p1334_p7 = pnand %p1333_p4, %p1508_p5 }
 0x69c   : > { %p1339_p11 = por %p1338_p10, %p1337_p9 }
 0x69d   : > { %p1335_p8 = pneg %p1334_p7 }
 0x69f   : > { %p1340_p12 = pnand %p1339_p11, %p1335_p8 }
 0x6a1   : > { %1343 = shalt.err (!%p1340_p12)
}
 0x6a2   : > { %s1385_s2 = smov 128   ;;  %s1386_s3 = smov 8  }
 0x6a3   : > { %1224 = dma.vmem_to_hbm [thread:$0]  (%p1508_p5), %s1680_s27, 256, %s1685_s0, %s1688_s1, %s1385_s2, %s1385_s2, %s1386_s3  }
 0x6a4 PF: > { %p1230_p13 = scmp.ge.s32.totalorder %s1378_s23, 2  ;;  %s1052_s10 = sand.u32 1, %s1366_s20  }
 0x6a5   : > { %s1053_s19 = scalar_lea.sflag [#allocation4], %s1052_s10 }
 0x6a6   : > { %p1227_p0 = pnand %p1230_p13, %p1512_p6 }
 0x6a8   : > { %p1228_p1 = pneg %p1227_p0 }
 0x6aa   : > { %1361 = dma.done.wait (%p1228_p1), %s1053_s19, 256  }
 0x6ab   : > { %1363 = vsyncadd (%p1228_p1), %s1053_s19, 4294967040  ;;  %p27_p2 = scmp.ge.s32.totalorder %s1495_s25, 4   ;;  %s1760_s20 = smov %s1370_s21 }
 0x6ac   : > { %s1761_s21 = smov %s1374_s22  ;;  %s1762_s22 = smov %s1506_s28 }
 0x6ad   : > { %s1763_s23 = smov %s1495_s25  ;;  %29 = sbr.rel (!%p27_p2) target bundleno = 9 (0x9), region = 123 }
 0x6b2   :  { %1066 = vsyncpa [#allocation4], 1 }
 0x6b3   :  { %1068 = vsyncpa [#allocation4 + $0x1], 1 }

</bundles_post_ra>
